<compile_context>
chip_gen: v7x
topology: tpu7x:2x2x1
jax: 0.10.0
libtpu: 0.0.40
codegen_flags: <defaults>
</compile_context>

<pallas_src>
import functools
import math

import jax
import jax.numpy as jnp
from jax import lax
from jax.experimental import pallas as pl
from jax.experimental.pallas import tpu as pltpu


# ----------------------- kernel 1: GroupNorm raw sums -------------------------
def _gn_stats_kernel(x_ref, s_ref, s2_ref):
    """Accumulate per-channel sum(x) and sum(x*x) over the (padded) T axis."""
    @pl.when(pl.program_id(1) == 0)
    def _():
        s_ref[...] = jnp.zeros(s_ref.shape, jnp.float32)
        s2_ref[...] = jnp.zeros(s2_ref.shape, jnp.float32)

    x = x_ref[0]                                            # (C, TT) f32
    s_ref[0] += jnp.sum(x, axis=1, keepdims=True)           # (C, 1)
    s2_ref[0] += jnp.sum(x * x, axis=1, keepdims=True)      # (C, 1)


# ----------------- kernel 2: apply GroupNorm + qkv 1x1 conv -------------------
def _norm_qkv_kernel(x_ref, scale_ref, shift_ref, wqkv_ref, bqkv_ref, qkv_ref):
    xn = x_ref[0] * scale_ref[0] + shift_ref[0]             # (C, TT) f32
    qkv = jnp.dot(wqkv_ref[...], xn.astype(jnp.bfloat16),
                  preferred_element_type=jnp.float32)       # (3C, TT) f32
    qkv_ref[0] = (qkv + bqkv_ref[...]).astype(jnp.bfloat16)


# ------------- kernel 3: per-head flash attention, K/V VMEM-resident ----------
def _attn_head_kernel(q_ref, k_ref, v_ref, a_ref, *, t_real: int, t_pad: int,
                      tk: int):
    q = q_ref[0]                                            # (ch, TQ) bf16
    ch, tq = q.shape
    n_kv = t_pad // tk

    def _step(start, m, l, acc, mask):
        k = k_ref[0, :, pl.ds(start, tk)]                   # (ch, TK) bf16
        v = v_ref[0, :, pl.ds(start, tk)]                   # (ch, TK) bf16
        # scores^T[s, t] = sum_c k[c, s] * q[c, t] — keys on the sublane axis,
        # so stats (1, TQ) align with the (ch, TQ) accumulator, no transposes.
        st = lax.dot_general(k, q, (((0,), (0,)), ((), ())),
                             preferred_element_type=jnp.float32)  # (TK, TQ)
        if mask:  # only the statically-last kv tile can contain padded keys
            key_id = start + lax.broadcasted_iota(jnp.int32, st.shape, 0)
            st = jnp.where(key_id < t_real, st, -1e30)
        m_new = jnp.maximum(m, jnp.max(st, axis=0, keepdims=True))
        alpha = jnp.exp(m - m_new)                          # (1, TQ)
        # TODO(synk): on v6e/v7x p = exp(...) in bf16 ~doubles EUP throughput;
        # kept f32 for v5e compatibility and precision.
        p = jnp.exp(st - m_new)                             # (TK, TQ) f32
        l_new = alpha * l + jnp.sum(p, axis=0, keepdims=True)
        acc_new = alpha * acc + lax.dot_general(
            v, p.astype(jnp.bfloat16), (((1,), (0,)), ((), ())),
            preferred_element_type=jnp.float32)             # (ch, TQ)
        return m_new, l_new, acc_new

    m0 = jnp.full((1, tq), -jnp.inf, jnp.float32)
    l0 = jnp.zeros((1, tq), jnp.float32)
    acc0 = jnp.zeros((ch, tq), jnp.float32)

    has_pad = t_pad != t_real
    n_full = n_kv - 1 if has_pad else n_kv

    def body(i, carry):
        m, l, acc = carry
        start = pl.multiple_of(i * tk, 128)
        return _step(start, m, l, acc, mask=False)

    m, l, acc = lax.fori_loop(0, n_full, body, (m0, l0, acc0))
    if has_pad:
        m, l, acc = _step((n_kv - 1) * tk, m, l, acc, mask=True)

    # Exact divide on the (1, TQ) denominator (cheap, avoids approx-recip bias).
    a_ref[0] = (acc * (1.0 / l)).astype(a_ref.dtype)


# --------------------- kernel 4: proj_out (full-C) + residual -----------------
def _proj_residual_kernel(a_ref, x_ref, w_ref, b_ref, o_ref):
    h = jnp.dot(w_ref[...], a_ref[0], preferred_element_type=jnp.float32)
    o_ref[0] = x_ref[0] + b_ref[...] + h


# --------------------------------- wrapper ------------------------------------
def _vmem_limit_bytes() -> int:
    """Per-generation VMEM budget (~3/4 of physical capacity)."""
    try:
        cap = int(pltpu.get_tpu_info().vmem_capacity_bytes)
    except Exception:
        cap = 64 * 1024 * 1024          # conservative (v7x-sized) fallback
    return max(32 * 1024 * 1024, (cap * 3) // 4)


def _pick_tile(t_pad: int, max_cols: int) -> int:
    """Largest lane-dense tile that divides t_pad and fits max_cols."""
    for c in (t_pad, 4096, 2048, 1024, 512, 256, 128):
        if c <= max_cols and t_pad % c == 0:
            return c
    return 128


def attention_block(x, params, *, num_heads: int, num_groups: int):
    """x: (B, C, H, W) float32 NCHW, matching the PyTorch module."""
    B, C, H, W = x.shape
    assert C % num_groups == 0 and C % num_heads == 0
    ch = C // num_heads
    assert ch % 8 == 0, "head dim must be a multiple of 8 for TPU tiling"
    cpg = C // num_groups

    T = H * W
    t_pad = ((T + 127) // 128) * 128
    x3 = x.reshape(B, C, T).astype(jnp.float32)
    if t_pad != T:
        x3 = jnp.pad(x3, ((0, 0), (0, 0), (0, t_pad - T)))

    vmem_lim = _vmem_limit_bytes()

    # Tile for the mem-bound kernels (1, 2, 4): biggest slab whose
    # double-buffered blocks fit in ~half the VMEM budget.
    col_bytes = 2 * C * 4 + 2 * 3 * C * 2 + 2 * C * 4      # x in, qkv out, o out
    fixed = 2 * 3 * C * C * 2 + 2 * C * C * 2 + 8 * C * 4  # weights + biases
    max_tt_cols = max(128, (vmem_lim // 2 - fixed) // col_bytes)
    tt = _pick_tile(t_pad, max_tt_cols)

    # Attention tiles: K/V are held fully VMEM-resident per (batch, head).
    tk = _pick_tile(t_pad, 512)                            # in-kernel kv slice
    kv_fixed = 2 * 2 * 2 * ch * t_pad                      # K+V, dbuf, bf16
    attn_col = 2 * 2 * ch * 2 + 4 * ch + 2 * 4 * tk        # q/out dbuf, acc, st/p
    max_q_cols = max(128, (vmem_lim // 2 - kv_fixed) // attn_col)
    tq = _pick_tile(t_pad, min(512, max_q_cols))
    # v7x megacore: keep at least two schedulable work items on parallel axes.
    if B * num_heads * (t_pad // tq) < 2 and t_pad % 256 == 0:
        tq = t_pad // 2
    # TODO(synk): for extremely large T where the per-head bf16 K/V block no
    # longer fits the VMEM budget, fall back to streaming K/V over a grid axis.

    # ---- parameter prep (one-time transforms) --------------------------------
    gamma = params["gn_weight"].astype(jnp.float32).reshape(1, C)
    beta = params["gn_bias"].astype(jnp.float32).reshape(1, C)

    # Fold the 1/sqrt(sqrt(ch)) attention scale into the q and k rows of the
    # qkv projection (rows are laid out [head][q(ch), k(ch), v(ch)]).
    qk_scale = 1.0 / math.sqrt(math.sqrt(ch))
    row_in_head = jnp.arange(3 * C) % (3 * ch)
    row_scale = jnp.where(row_in_head < 2 * ch, qk_scale, 1.0).astype(jnp.float32)
    wqkv = (params["qkv_weight"].reshape(3 * C, C).astype(jnp.float32)
            * row_scale[:, None]).astype(jnp.bfloat16)
    bqkv = (params["qkv_bias"].reshape(3 * C, 1).astype(jnp.float32)
            * row_scale[:, None])

    wproj = params["proj_weight"].reshape(C, C).astype(jnp.bfloat16)
    bproj = params["proj_bias"].reshape(C, 1).astype(jnp.float32)

    # ---- 1) GroupNorm raw sums (pure mem-bound reduce) ------------------------
    s, s2 = pl.pallas_call(
        _gn_stats_kernel,
        out_shape=(jax.ShapeDtypeStruct((B, C, 1), jnp.float32),
                   jax.ShapeDtypeStruct((B, C, 1), jnp.float32)),
        grid_spec=pltpu.PrefetchScalarGridSpec(
            num_scalar_prefetch=0,
            grid=(B, t_pad // tt),
            in_specs=[pl.BlockSpec((1, C, tt), lambda b, t: (b, 0, t))],
            out_specs=[pl.BlockSpec((1, C, 1), lambda b, t: (b, 0, 0)),
                       pl.BlockSpec((1, C, 1), lambda b, t: (b, 0, 0))],
        ),
        compiler_params=pltpu.CompilerParams(
            dimension_semantics=("parallel", "arbitrary"),
            vmem_limit_bytes=vmem_lim),
    )(x3)

    # ---- group combine + folded affine (tiny, plain JAX) ----------------------
    cnt = jnp.float32(cpg * T)
    mean_g = s.reshape(B, num_groups, cpg).sum(axis=2) / cnt
    ex2_g = s2.reshape(B, num_groups, cpg).sum(axis=2) / cnt
    # TODO(synk): single-pass E[x^2]-mean^2 variance in f32; use a two-pass /
    # Welford reduction for activations with very large mean/std ratio.
    var_g = ex2_g - mean_g * mean_g
    rstd_g = lax.rsqrt(var_g + 1e-5)
    mean_c = jnp.repeat(mean_g, cpg, axis=1)               # (B, C)
    rstd_c = jnp.repeat(rstd_g, cpg, axis=1)                # (B, C)
    scale = (gamma * rstd_c)[:, :, None]                    # (B, C, 1)
    shift = (beta - mean_c * gamma * rstd_c)[:, :, None]    # (B, C, 1)

    # ---- 2) fused GroupNorm-apply + qkv 1x1 conv (bf16 output) ---------------
    qkv = pl.pallas_call(
        _norm_qkv_kernel,
        out_shape=jax.ShapeDtypeStruct((B, 3 * C, t_pad), jnp.bfloat16),
        grid_spec=pltpu.PrefetchScalarGridSpec(
            num_scalar_prefetch=0,
            grid=(B, t_pad // tt),
            in_specs=[
                pl.BlockSpec((1, C, tt), lambda b, t: (b, 0, t)),
                pl.BlockSpec((1, C, 1), lambda b, t: (b, 0, 0)),
                pl.BlockSpec((1, C, 1), lambda b, t: (b, 0, 0)),
                pl.BlockSpec((3 * C, C), lambda b, t: (0, 0)),
                pl.BlockSpec((3 * C, 1), lambda b, t: (0, 0)),
            ],
            out_specs=pl.BlockSpec((1, 3 * C, tt), lambda b, t: (b, 0, t)),
        ),
        compiler_params=pltpu.CompilerParams(
            dimension_semantics=("parallel", "parallel"),
            vmem_limit_bytes=vmem_lim),
    )(x3, scale, shift, wqkv, bqkv)

    # ---- 3) per-head flash attention (K/V resident, no HBM re-stream) --------
    a_heads = pl.pallas_call(
        functools.partial(_attn_head_kernel, t_real=T, t_pad=t_pad, tk=tk),
        out_shape=jax.ShapeDtypeStruct((B, C, t_pad), jnp.bfloat16),
        grid_spec=pltpu.PrefetchScalarGridSpec(
            num_scalar_prefetch=0,
            grid=(B, num_heads, t_pad // tq),
            in_specs=[
                # qkv channel layout is [head][q, k, v] with blocks of size ch.
                pl.BlockSpec((1, ch, tq), lambda b, h, qt: (b, 3 * h, qt)),
                # K/V: full per-head T extent, constant index over qt ->
                # fetched once per (b, h) and reused for every query tile.
                pl.BlockSpec((1, ch, t_pad), lambda b, h, qt: (b, 3 * h + 1, 0)),
                pl.BlockSpec((1, ch, t_pad), lambda b, h, qt: (b, 3 * h + 2, 0)),
            ],
            out_specs=pl.BlockSpec((1, ch, tq), lambda b, h, qt: (b, h, qt)),
        ),
        compiler_params=pltpu.CompilerParams(
            dimension_semantics=("parallel", "parallel", "parallel"),
            vmem_limit_bytes=vmem_lim),
    )(qkv, qkv, qkv)

    # ---- 4) proj_out (full-C contraction) + residual --------------------------
    out = pl.pallas_call(
        _proj_residual_kernel,
        out_shape=jax.ShapeDtypeStruct((B, C, t_pad), jnp.float32),
        grid_spec=pltpu.PrefetchScalarGridSpec(
            num_scalar_prefetch=0,
            grid=(B, t_pad // tt),
            in_specs=[
                pl.BlockSpec((1, C, tt), lambda b, t: (b, 0, t)),
                pl.BlockSpec((1, C, tt), lambda b, t: (b, 0, t)),
                pl.BlockSpec((C, C), lambda b, t: (0, 0)),
                pl.BlockSpec((C, 1), lambda b, t: (0, 0)),
            ],
            out_specs=pl.BlockSpec((1, C, tt), lambda b, t: (b, 0, t)),
        ),
        compiler_params=pltpu.CompilerParams(
            dimension_semantics=("parallel", "parallel"),
            vmem_limit_bytes=vmem_lim),
    )(a_heads, x3, wproj, bproj)

    return out[:, :, :T].reshape(B, C, H, W)


# ----------------------------- pure-JAX reference -----------------------------
def attention_block_ref(x, params, *, num_heads: int, num_groups: int):
    B, C, H, W = x.shape
    T = H * W
    x3 = x.reshape(B, C, T).astype(jnp.float32)

    xg = x3.reshape(B, num_groups, (C // num_groups) * T)
    mean = xg.mean(axis=-1, keepdims=True)
    var = xg.var(axis=-1, keepdims=True)
    xn = ((xg - mean) / jnp.sqrt(var + 1e-5)).reshape(B, C, T)
    xn = xn * params["gn_weight"].reshape(1, C, 1) + params["gn_bias"].reshape(1, C, 1)

    qkv = jnp.einsum("oc,bct->bot", params["qkv_weight"].reshape(3 * C, C), xn) \
        + params["qkv_bias"].reshape(1, 3 * C, 1)

    ch = C // num_heads
    qkv_h = qkv.reshape(B * num_heads, 3 * ch, T)
    q, k, v = qkv_h[:, :ch], qkv_h[:, ch:2 * ch], qkv_h[:, 2 * ch:]
    scale = 1.0 / math.sqrt(math.sqrt(ch))
    w = jnp.einsum("bct,bcs->bts", q * scale, k * scale)
    w = jax.nn.softmax(w, axis=-1)
    a = jnp.einsum("bts,bcs->bct", w, v).reshape(B, C, T)

    h_out = jnp.einsum("oc,bct->bot", params["proj_weight"].reshape(C, C), a) \
        + params["proj_bias"].reshape(1, C, 1)
    return (x3 + h_out).reshape(B, C, H, W)


if __name__ == "__main__":
    NUM_HEADS, NUM_GROUPS = 4, 8
    B, C, HH, WW = 2, 32, 16, 16

    key = jax.random.PRNGKey(0)
    k_x, k_g, k_b, k_wq, k_bq, k_wp, k_x2 = jax.random.split(key, 7)

    x = jax.random.normal(k_x, (B, C, HH, WW), dtype=jnp.float32)

    params = {
        "gn_weight": 1.0 + 0.1 * jax.random.normal(k_g, (C,), jnp.float32),
        "gn_bias": 0.1 * jax.random.normal(k_b, (C,), jnp.float32),
        "qkv_weight": 0.1 * jax.random.normal(k_wq, (3 * C, C), jnp.float32),
        "qkv_bias": 0.1 * jax.random.normal(k_bq, (3 * C,), jnp.float32),
        # Module-faithful init: proj_out weight/bias are zeroed in __init__.
        "proj_weight": jnp.zeros((C, C), jnp.float32),
        "proj_bias": jnp.zeros((C,), jnp.float32),
    }

    # 1) Module-faithful run (zero proj) -> output must equal the input.
    out = jax.block_until_ready(
        attention_block(x, params, num_heads=NUM_HEADS, num_groups=NUM_GROUPS))
    ref = attention_block_ref(x, params, num_heads=NUM_HEADS, num_groups=NUM_GROUPS)
    assert out.shape == (B, C, HH, WW)
    assert jnp.allclose(out, ref, atol=1e-5, rtol=1e-5)

    # 2) Non-zero proj weights so the full attention + projection path is
    #    exercised (bf16 MXU path -> looser tolerance vs the f32 reference).
    params_nz = dict(params)
    params_nz["proj_weight"] = 0.1 * jax.random.normal(k_wp, (C, C), jnp.float32)
    params_nz["proj_bias"] = 0.05 * jnp.ones((C,), jnp.float32)
    out_nz = jax.block_until_ready(
        attention_block(x, params_nz, num_heads=NUM_HEADS, num_groups=NUM_GROUPS))
    ref_nz = attention_block_ref(x, params_nz, num_heads=NUM_HEADS,
                                 num_groups=NUM_GROUPS)
    assert jnp.allclose(out_nz, ref_nz, atol=2e-2, rtol=2e-2)

    # 3) Non-lane-aligned spatial size (T = 8*8 = 64 -> padded to 128, masked
    #    last kv tile path).
    x_small = jax.random.normal(k_x2, (B, C, 8, 8), dtype=jnp.float32)
    out_s = jax.block_until_ready(
        attention_block(x_small, params_nz, num_heads=NUM_HEADS,
                        num_groups=NUM_GROUPS))
    ref_s = attention_block_ref(x_small, params_nz, num_heads=NUM_HEADS,
                                num_groups=NUM_GROUPS)
    assert jnp.allclose(out_s, ref_s, atol=2e-2, rtol=2e-2)

    print("KERNEL_OK")
</pallas_src>

<mosaic_0001>
module attributes {stable_mosaic.version = 11 : i64} {
  func.func @_gn_stats_kernel(%arg0: i32, %arg1: i32, %arg2: memref<1x32x256xf32, #tpu.memory_space<vmem>>, %arg3: memref<1x32x1xf32, #tpu.memory_space<vmem>>, %arg4: memref<1x32x1xf32, #tpu.memory_space<vmem>>) attributes {dimension_semantics = [#tpu.dimension_semantics<parallel>, #tpu.dimension_semantics<arbitrary>], iteration_bounds = array<i64: 2, 1>, scalar_prefetch = 0 : i64, scratch_operands = 0 : i64, tpu.core_type = #tpu.core_type<tc>, window_params = [{transform_indices = @transform_0, window_bounds = array<i64: 1, 32, 256>}, {transform_indices = @transform_1, window_bounds = array<i64: 1, 32, 1>}, {transform_indices = @transform_2, window_bounds = array<i64: 1, 32, 1>}]} {
    %c0_i32 = arith.constant 0 : i32
    %0 = arith.cmpi eq, %arg1, %c0_i32 : i32
    %1 = arith.extui %0 : i1 to i32
    %c0_i32_0 = arith.constant 0 : i32
    %2 = arith.cmpi ne, %1, %c0_i32_0 : i32
    scf.if %2 {
      %cst_16 = arith.constant 0.000000e+00 : f32
      %22 = vector.broadcast %cst_16 : f32 to vector<1x32x1xf32>
      %c0_17 = arith.constant 0 : index
      %c0_18 = arith.constant 0 : index
      %c0_19 = arith.constant 0 : index
      %23 = vector.load %arg3[%c0_17, %c0_18, %c0_19] : memref<1x32x1xf32, #tpu.memory_space<vmem>>, vector<1x32x1xf32>
      tpu.vector_store %arg3[%c0_17, %c0_18, %c0_19], %22 {strides = array<i32>} : memref<1x32x1xf32, #tpu.memory_space<vmem>>, vector<1x32x1xf32>,
      %cst_20 = arith.constant 0.000000e+00 : f32
      %24 = vector.broadcast %cst_20 : f32 to vector<1x32x1xf32>
      %c0_21 = arith.constant 0 : index
      %c0_22 = arith.constant 0 : index
      %c0_23 = arith.constant 0 : index
      %25 = vector.load %arg4[%c0_21, %c0_22, %c0_23] : memref<1x32x1xf32, #tpu.memory_space<vmem>>, vector<1x32x1xf32>
      tpu.vector_store %arg4[%c0_21, %c0_22, %c0_23], %24 {strides = array<i32>} : memref<1x32x1xf32, #tpu.memory_space<vmem>>, vector<1x32x1xf32>,
    } else {
    }
    %c0 = arith.constant 0 : index
    %c0_1 = arith.constant 0 : index
    %c0_2 = arith.constant 0 : index
    %3 = vector.load %arg2[%c0, %c0_1, %c0_2] : memref<1x32x256xf32, #tpu.memory_space<vmem>>, vector<1x32x256xf32>
    %4 = vector.shape_cast %3 : vector<1x32x256xf32> to vector<32x256xf32>
    %c0_3 = arith.constant 0 : index
    %c0_4 = arith.constant 0 : index
    %c0_5 = arith.constant 0 : index
    %5 = vector.load %arg3[%c0_3, %c0_4, %c0_5] : memref<1x32x1xf32, #tpu.memory_space<vmem>>, vector<1x32x1xf32>
    %6 = vector.shape_cast %5 : vector<1x32x1xf32> to vector<32x1xf32>
    %cst = arith.constant dense<0.000000e+00> : vector<32xf32>
    %7 = vector.multi_reduction <add>, %4, %cst [1] : vector<32x256xf32> to vector<32xf32>
    %8 = vector.shape_cast %7 : vector<32xf32> to vector<32x1xf32>
    %9 = arith.addf %6, %8 : vector<32x1xf32>
    %c0_6 = arith.constant 0 : index
    %c0_7 = arith.constant 0 : index
    %c0_8 = arith.constant 0 : index
    %10 = vector.load %arg3[%c0_6, %c0_7, %c0_8] : memref<1x32x1xf32, #tpu.memory_space<vmem>>, vector<1x32x1xf32>
    %11 = vector.shape_cast %10 : vector<1x32x1xf32> to vector<32x1xf32>
    %12 = vector.shape_cast %9 : vector<32x1xf32> to vector<1x32x1xf32>
    tpu.vector_store %arg3[%c0_6, %c0_7, %c0_8], %12 {strides = array<i32>} : memref<1x32x1xf32, #tpu.memory_space<vmem>>, vector<1x32x1xf32>,
    %c0_9 = arith.constant 0 : index
    %c0_10 = arith.constant 0 : index
    %c0_11 = arith.constant 0 : index
    %13 = vector.load %arg4[%c0_9, %c0_10, %c0_11] : memref<1x32x1xf32, #tpu.memory_space<vmem>>, vector<1x32x1xf32>
    %14 = vector.shape_cast %13 : vector<1x32x1xf32> to vector<32x1xf32>
    %15 = arith.mulf %4, %4 : vector<32x256xf32>
    %cst_12 = arith.constant dense<0.000000e+00> : vector<32xf32>
    %16 = vector.multi_reduction <add>, %15, %cst_12 [1] : vector<32x256xf32> to vector<32xf32>
    %17 = vector.shape_cast %16 : vector<32xf32> to vector<32x1xf32>
    %18 = arith.addf %14, %17 : vector<32x1xf32>
    %c0_13 = arith.constant 0 : index
    %c0_14 = arith.constant 0 : index
    %c0_15 = arith.constant 0 : index
    %19 = vector.load %arg4[%c0_13, %c0_14, %c0_15] : memref<1x32x1xf32, #tpu.memory_space<vmem>>, vector<1x32x1xf32>
    %20 = vector.shape_cast %19 : vector<1x32x1xf32> to vector<32x1xf32>
    %21 = vector.shape_cast %18 : vector<32x1xf32> to vector<1x32x1xf32>
    tpu.vector_store %arg4[%c0_13, %c0_14, %c0_15], %21 {strides = array<i32>} : memref<1x32x1xf32, #tpu.memory_space<vmem>>, vector<1x32x1xf32>,
    return
  }
  func.func @transform_0(%arg0: i32, %arg1: i32) -> (i32, i32, i32) {
    %c0_i32 = arith.constant 0 : i32
    %c0_i32_0 = arith.constant 0 : i32
    return %arg0, %c0_i32, %arg1 : i32, i32, i32
  }
  func.func @transform_1(%arg0: i32, %arg1: i32) -> (i32, i32, i32) {
    %c0_i32 = arith.constant 0 : i32
    %c0_i32_0 = arith.constant 0 : i32
    %c0_i32_1 = arith.constant 0 : i32
    return %arg0, %c0_i32, %c0_i32_0 : i32, i32, i32
  }
  func.func @transform_2(%arg0: i32, %arg1: i32) -> (i32, i32, i32) {
    %c0_i32 = arith.constant 0 : i32
    %c0_i32_0 = arith.constant 0 : i32
    %c0_i32_1 = arith.constant 0 : i32
    return %arg0, %c0_i32, %c0_i32_0 : i32, i32, i32
  }
}

</mosaic_0001>

<bundles_post_ra>
// kernel: tpu_custom_call.1
= control target key start
LH: loop header
LB: loop body
LE: loop exit
PB: predicated region body
PF: predicated region fallthrough
CT: control target
= control target key end

     0   :  { %8 = vsyncpa [#allocation3], 0  ;;  %s738_s0 = inlined_call_operand.hbm [shape: f32[2,32,256], index: 0, kind: input, shape index: {}]   ;;  %s739_s1 = inlined_call_operand.vmem [shape: f32[2,32,1], index: 1, kind: output, shape index: {0}]   ;;  %s740_s2 = inlined_call_operand.vmem [shape: f32[2,32,1], index: 2, kind: output, shape index: {1}]  }
   0x1   :  { %10 = vsyncpa [#allocation3 + $0x1], 0  ;;  %s560_s9 = smov 0   ;;  %s562_s10 = smov 0  }
   0x2   :  { %s564_s11 = smov 0   ;;  %s566_s12 = smov 0  }
   0x3   :  { %s568_s13 = smov 0   ;;  %s570_s14 = smov 0  }
   0x4 LB: > { %s383_s15 = sadd.s32 4294967295, %s539_s14   ;;  %s28_s16 = sadd.s32 1, %s535_s13  ;;  %s539_s14 = sphi %s570_s14, %s16_s14   ;;  %s535_s13 = sphi %s568_s13, %s748_s13   ;;  %s531_s12 = sphi %s566_s12, %s747_s12   ;;  %s527_s11 = sphi %s564_s11, %s746_s11   ;;  %s523_s10 = sphi %s562_s10, %s745_s10   ;;  %s519_s9 = sphi %s560_s9, %s744_s9  }
   0x5   : > { %p30_p0 = scmp.ge.s32.totalorder %s28_s16, 2  ;;  %s37_s17 = sadd.s32 1, %s527_s11 }
   0x6   : > { %p44_p1 = scmp.ne.s32.totalorder %s527_s11, %s523_s10  ;;  %p45_p2 = scmp.eq.s32.totalorder %s539_s14, 0 }
   0x7   : > { %s750_s16 = smov (%p30_p0, %s28_s16), 0  ;;  %p50_p4 = scmp.ne.s32.totalorder %s523_s10, %s519_s9 }
   0x8   : > { %p596_p3 = por %p45_p2, %p44_p1  ;;  %s32_s19 = ssub.s32 %s535_s13, %s750_s16 }
   0x9   : > { %p51_p5 = scmp.eq.s32.totalorder %s383_s15, 0  ;;  %p35_p6 = scmp.eq.s32.totalorder %s32_s19, 0 }
   0xa   : > { %p407_p8 = scmp.lt.s32.totalorder %s539_s14, 2  ;;  %s126_s22 = sand.u32 1, %s527_s11  }
   0xb   : > { %p603_p7 = por %p51_p5, %p50_p4  ;;  %s398_s23 = sshll.u32 %s535_s13, 10 }
   0xc   : > { %s609_s21 = scalar_select %p35_p6, %s527_s11, %s37_s17  }
   0xd   : > { %s387_s24 = sshll.u32 %s126_s22, 6  ;;  %s616_s27 = scalar_lea.hbm %s738_s0, %s398_s23 }
   0xe   : > { %s130_s28 = scalar_lea.vmem [#allocation2], %s387_s24  ;;  %p620_p9 = pnand %p407_p8, %p596_p3 }
   0xf   : > { %s139_s29 = sshll.u32 %s130_s28, 4  ;;  %s626_s3 = scalar_lea.sflag [#allocation3], %s126_s22  ;;  %s624_s29 = int_to_ptr.vmem [resolvable:$true] %s139_s29 }
  0x10   : > { %s459_s4 = scalar_lea.hbm %s616_s27, 1024  ;;  %p461_p11 = pneg %p620_p9 }
  0x11   : > { %p460_p10 = scmp.ne.s32.totalorder %s616_s27, %s459_s4  ;;  %s464_s7 = scalar_lea.hbm %s738_s0, 2048 }
  0x12   : > { %p465_p0 = scmp.lt.u32.totalorder %s616_s27, %s738_s0  ;;  %p466_p1 = scmp.lt.u32.totalorder %s464_s7, %s459_s4 }
  0x13   : > { %p462_p12 = pnand %p461_p11, %p460_p10  ;;  %p468_p3 = scmp.lt.u32.totalorder %s459_s4, %s616_s27 }
  0x14   : > { %p467_p2 = por %p466_p1, %p465_p0 }
  0x15   : > { %p463_p13 = pneg %p462_p12 }
  0x16   : > { %p469_p4 = por %p468_p3, %p467_p2 }
  0x18   : > { %p470_p5 = pnand %p469_p4, %p463_p13 }
  0x1a   : > { %473 = shalt.err (!%p470_p5)
}
  0x1b   : > { %s474_s15 = scalar_lea.vmem %s624_s29, 1024  ;;  %s541_s17 = smov [#allocation2]  }
  0x1c   : > { %p475_p6 = scmp.ne.s32.totalorder %s624_s29, %s474_s15  ;;  %s479_s18 = sshll.u32 %s541_s17, 4  ;;  %s480_s18 = int_to_ptr.vmem [resolvable:$false] %s479_s18 }
  0x1d   : > { %s481_s19 = scalar_lea.vmem %s480_s18, 2048  ;;  %p482_p12 = scmp.lt.s32.totalorder %s624_s29, %s480_s18 }
  0x1e   : > { %p477_p8 = pnand %p475_p6, %p461_p11  ;;  %p483_p0 = scmp.lt.s32.totalorder %s481_s19, %s474_s15 }
  0x20   : > { %p478_p10 = pneg %p477_p8  ;;  %p484_p1 = por %p483_p0, %p482_p12 }
  0x22   : > { %p485_p2 = pnand %p484_p1, %p478_p10 }
  0x24   : > { %488 = shalt.err (!%p485_p2)
}
  0x25   : > { %s542_s22 = smov 256   ;;  %s543_s23 = smov 16  }
  0x26   : > { %406 = dma.hbm_to_vmem [thread:$0]  (!%p620_p9), %s616_s27, 1024, %s624_s29, %s626_s3, %s542_s22, %s542_s22, %s543_s23  }
  0x27   : > { %p390_p11 = scmp.ge.s32.totalorder %s539_s14, 1  ;;  %p147_p13 = scmp.lt.s32.totalorder %s539_s14, 3 }
  0x29   : > { %p148_p3 = pnand %p390_p11, %p147_p13 }
  0x2a   : > { %s153_s24 = sand.u32 (!%p148_p3), 1, %s523_s10  }
  0x2b   : > { %151 = sbr.rel (%p148_p3) target bundleno = 212 (0xd4), region = 24  ;;  %s391_s25 = sshll.u32 (!%p148_p3), %s153_s24, 6 }
  0x2c   : > { %s154_s26 = scalar_lea.sflag (!%p148_p3), [#allocation3], %s153_s24  ;;  %s157_s28 = scalar_lea.vmem (!%p148_p3), [#allocation2], %s391_s25 }
  0x32   : > { %514 = dma.done.wait (%p603_p7), %s154_s26, 1024  }
  0x33   : > { %516 = vsyncadd (%p603_p7), %s154_s26, 4294966272  ;;  %p184_p4 = scmp.lt.s32.totalorder %s531_s12, 1  ;;  %vm198_vm0 = vcmask 7168   ;;  %v544_v0 = vmov 0.0   ;;  %v211_v1 = vld [vmem:[%s157_s28 + $0x20] sm:$0xff]  ;;  %v212_v2 = vld [vmem:[%s157_s28 + $0x28] sm:$0xff] }
  0x34   : > { %v207_v3 = vld [vmem:[%s157_s28] sm:$0xff]  ;;  %v225_v4 = vadd.f32 %v212_v2, %v211_v1  ;;  %v208_v5 = vld [vmem:[%s157_s28 + $0x8] sm:$0xff]  ;;  %v213_v6 = vld [vmem:[%s157_s28 + $0x30] sm:$0xff]  ;;  %v248_v20 = vmul.f32 %v211_v1, %v211_v1  ;;  %v249_v21 = vmul.f32 %v212_v2, %v212_v2 }
  0x35   : > { %s752_s12 = smov (!%p184_p4, %s531_s12), 1  ;;  %v214_v7 = vld [vmem:[%s157_s28 + $0x38] sm:$0xff]  ;;  %v219_v8 = vadd.f32 %v208_v5, %v207_v3  ;;  %v209_v9 = vld [vmem:[%s157_s28 + $0x10] sm:$0xff]  ;;  %v244_v14 = vmul.f32 %v207_v3, %v207_v3  ;;  %v245_v15 = vmul.f32 %v208_v5, %v208_v5  ;;  %v250_v18 = vmul.f32 %v213_v6, %v213_v6 }
  0x36   : > { %s399_s27 = sshll.u32 %s752_s12, 5  ;;  %v210_v10 = vld [vmem:[%s157_s28 + $0x18] sm:$0xff]  ;;  %226 = vadd.xlane.f32.xlu1 %v225_v4  ;;  %v228_v11 = vadd.f32 %v214_v7, %v213_v6  ;;  %v246_v12 = vmul.f32 %v209_v9, %v209_v9  ;;  %v251_v19 = vmul.f32 %v214_v7, %v214_v7  ;;  %v258_v24 = vadd.f32 %v249_v21, %v248_v20 }
  0x37   : > { %s671_s3 = scalar_lea.vmem %s739_s1, %s399_s27  ;;  %v247_v13 = vmul.f32 %v210_v10, %v210_v10  ;;  %220 = vadd.xlane.f32.xlu0 %v219_v8  ;;  %v222_v16 = vadd.f32 %v210_v10, %v209_v9  ;;  %v252_v22 = vadd.f32 %v245_v15, %v244_v14  ;;  %s686_s5 = scalar_lea.vmem %s740_s2, %s399_s27 }
  0x38   : > { %201 = vst.msk [vmem:[%s671_s3 + $0x10] sm:$0xff] %vm198_vm0, %v544_v0  ;;  %199 = vst.msk [vmem:[%s671_s3] sm:$0xff] %vm198_vm0, %v544_v0  ;;  %v261_v23 = vadd.f32 %v251_v19, %v250_v18 }
  0x39   : > { %200 = vst.msk [vmem:[%s671_s3 + $0x8] sm:$0xff] %vm198_vm0, %v544_v0  ;;  %202 = vst.msk [vmem:[%s671_s3 + $0x18] sm:$0xff] %vm198_vm0, %v544_v0  ;;  %v255_v17 = vadd.f32 %v247_v13, %v246_v12 }
  0x3a   : > { %229 = vadd.xlane.f32.xlu1 %v228_v11  ;;  %204 = vst.msk [vmem:[%s686_s5 + $0x8] sm:$0xff] %vm198_vm0, %v544_v0  ;;  %203 = vst.msk [vmem:[%s686_s5] sm:$0xff] %vm198_vm0, %v544_v0 }
  0x3b   : > { %223 = vadd.xlane.f32.xlu0 %v222_v16  ;;  %205 = vst.msk [vmem:[%s686_s5 + $0x10] sm:$0xff] %vm198_vm0, %v544_v0  ;;  %206 = vst.msk [vmem:[%s686_s5 + $0x18] sm:$0xff] %vm198_vm0, %v544_v0 }
  0x3e   : > { %256 = vadd.xlane.f32.xlu1 %v255_v17 }
  0x3f   : > { %253 = vadd.xlane.f32.xlu0 %v252_v22  ;;  %v217_v25 = vld [vmem:[%s671_s3 + $0x10] sm:$0xff]  ;;  %v215_v26 = vld [vmem:[%s671_s3] sm:$0xff] }
  0x40   : > { %v218_v31 = vld [vmem:[%s671_s3 + $0x18] sm:$0xff]  ;;  %v216_v32 = vld [vmem:[%s671_s3 + $0x8] sm:$0xff] }
  0x41   : > { %v241_v37 = vld [vmem:[%s686_s5 + $0x8] sm:$0xff]  ;;  %v240_v38 = vld [vmem:[%s686_s5] sm:$0xff] }
  0x42   : > { %262 = vadd.xlane.f32.xlu1 %v261_v23  ;;  %v243_v43 = vld [vmem:[%s686_s5 + $0x18] sm:$0xff]  ;;  %v242_v44 = vld [vmem:[%s686_s5 + $0x10] sm:$0xff] }
  0x43   : > { %259 = vadd.xlane.f32.xlu0 %v258_v24 }
  0xc3   : > { %v227_v27 = vpop.xlane.xlu1 %226 }
  0xc4   : > { %v233_v28 = vadd.f32 %v227_v27, %v217_v25  ;;  %v221_v29 = vpop.xlane.xlu0 %220 }
  0xc5   : > { %v231_v30 = vadd.f32 %v221_v29, %v215_v26 }
  0xc6   : > { %238 = vst.msk [vmem:[%s671_s3 + $0x10] sm:$0xff] %vm198_vm0, %v233_v28 }
  0xc7   : > { %236 = vst.msk [vmem:[%s671_s3] sm:$0xff] %vm198_vm0, %v231_v30  ;;  %v230_v33 = vpop.xlane.xlu1 %229 }
  0xc8   : > { %v234_v34 = vadd.f32 %v230_v33, %v218_v31  ;;  %v224_v35 = vpop.xlane.xlu0 %223 }
  0xc9   : > { %v232_v36 = vadd.f32 %v224_v35, %v216_v32 }
  0xca   : > { %239 = vst.msk [vmem:[%s671_s3 + $0x18] sm:$0xff] %vm198_vm0, %v234_v34 }
  0xcb   : > { %237 = vst.msk [vmem:[%s671_s3 + $0x8] sm:$0xff] %vm198_vm0, %v232_v36  ;;  %v257_v39 = vpop.xlane.xlu1 %256 }
  0xcc   : > { %v265_v40 = vadd.f32 %v257_v39, %v241_v37  ;;  %v254_v41 = vpop.xlane.xlu0 %253 }
  0xcd   : > { %v264_v42 = vadd.f32 %v254_v41, %v240_v38 }
  0xce   : > { %269 = vst.msk [vmem:[%s686_s5 + $0x8] sm:$0xff] %vm198_vm0, %v265_v40 }
  0xcf   : > { %268 = vst.msk [vmem:[%s686_s5] sm:$0xff] %vm198_vm0, %v264_v42  ;;  %v263_v45 = vpop.xlane.xlu1 %262 }
  0xd0   : > { %v267_v46 = vadd.f32 %v263_v45, %v243_v43  ;;  %v260_v47 = vpop.xlane.xlu0 %259 }
  0xd1   : > { %v266_v48 = vadd.f32 %v260_v47, %v242_v44 }
  0xd2   : > { %271 = vst.msk [vmem:[%s686_s5 + $0x18] sm:$0xff] %vm198_vm0, %v267_v46 }
  0xd3   : > { %270 = vst.msk [vmem:[%s686_s5 + $0x10] sm:$0xff] %vm198_vm0, %v266_v48 }
  0xd4 PF: > { %s16_s14 = sadd.s32 1, %s539_s14   ;;  %s744_s9 = smov %s523_s10 }
  0xd5   : > { %p13_p7 = scmp.ge.s32.totalorder %s16_s14, 4   ;;  %s745_s10 = smov %s527_s11 }
  0xd6   : > { %s746_s11 = smov %s609_s21  ;;  %s747_s12 = smov %s535_s13 }
  0xd7   : > { %s748_s13 = smov %s750_s16  ;;  %15 = sbr.rel (!%p13_p7) target bundleno = 4 (0x4), region = 80 }
  0xde   :  { %309 = vsyncpa [#allocation3], 1 }
  0xdf   :  { %311 = vsyncpa [#allocation3 + $0x1], 1 }

</bundles_post_ra>
